<compile_context>
chip_gen: v7x
topology: tpu7x:2x2x1
jax: 0.10.0
libtpu: 0.0.40
codegen_flags: <defaults>
</compile_context>

<pallas_src>
import jax
import jax.numpy as jnp
from jax.experimental import pallas as pl
from jax.experimental.pallas import tpu as pltpu

_LANES = 128
_PER_BUFFER_BUDGET = 20 * 1024 * 1024  # bytes per pipelined logits buffer


def _round_up(x, m):
    return ((x + m - 1) // m) * m


def _ce_tile_kernel(logits_ref, tgt_ref, partial_ref):
    """Per-tile partial sum of [logsumexp(logits_i) - logits_i[target_i]].

    Rows whose target is < 0 (padding rows) contribute 0 to the sum.
    """
    logits = logits_ref[...].astype(jnp.float32)       # (TILE_N, C) f32 in-kernel
    tgt = tgt_ref[...]                                  # (TILE_N, 1) int32

    # Numerically-stable shifted logits; reused by both the exp pass and the
    # target pick so only three lane (XLU) reductions happen per tile.
    m = jnp.max(logits, axis=-1, keepdims=True)                          # (TILE_N, 1)
    shifted = logits - m
    sum_exp = jnp.sum(jnp.exp(shifted), axis=-1, keepdims=True)          # (TILE_N, 1)

    cols = jax.lax.broadcasted_iota(jnp.int32, logits.shape, 1)          # (TILE_N, C)
    picked_shifted = jnp.sum(jnp.where(cols == tgt, shifted, 0.0),
                             axis=-1, keepdims=True)                     # (TILE_N, 1)

    # logsumexp - picked == (m + log(sum_exp)) - (picked_shifted + m)
    per_example = jnp.log(sum_exp) - picked_shifted                      # (TILE_N, 1)

    valid = (tgt >= 0).astype(jnp.float32)     # mask padded rows
    tile_sum = jnp.sum(per_example * valid)

    # Lane-dense, unmasked full-tile store; wrapper reads element [0, 0].
    partial_ref[...] = jnp.broadcast_to(tile_sum, (1, 8, _LANES))


def cross_entropy_loss(output, target, *, max_tile_n=1024):
    """Pallas equivalent of nn.CrossEntropyLoss()(output, target).

    output: (N, C) float logits (f32 or bf16; native dtype is streamed to VMEM)
    target: (N,)   integer class indices
    returns scalar float32 mean loss.
    """
    N, C = output.shape
    itemsize = jnp.dtype(output.dtype).itemsize

    # Tile-row count: big enough to amortize per-step overhead, small enough
    # that two in-flight logits buffers fit comfortably in VMEM (incl. v7x 64 MiB).
    rows_fit = max(8, (_PER_BUFFER_BUDGET // max(1, C * itemsize)) // 8 * 8)
    tile = min(max_tile_n, rows_fit, _round_up(N, 8))
    tile = max(8, (tile // 8) * 8)

    padded_n = _round_up(N, tile)
    pad = padded_n - N

    logits = output                       # keep native dtype through the DMA
    tgt = target.astype(jnp.int32)
    if pad:
        logits = jnp.pad(logits, ((0, pad), (0, 0)))
        tgt = jnp.pad(tgt, (0, pad), constant_values=-1)   # -1 => masked row
    tgt2d = tgt.reshape(padded_n, 1)

    num_tiles = padded_n // tile

    # Double-buffered logits + (lane-padded) targets + partial-sum output.
    needed = (2 * tile * C * itemsize
              + 2 * tile * _LANES * 4
              + 2 * 8 * _LANES * 4)
    vmem_limit = int(min(64 * 1024 * 1024, max(needed + (4 << 20), 16 << 20)))

    partials = pl.pallas_call(
        _ce_tile_kernel,
        out_shape=jax.ShapeDtypeStruct((num_tiles, 8, _LANES), jnp.float32),
        grid=(num_tiles,),
        in_specs=[
            pl.BlockSpec((tile, C), lambda i: (i, 0)),
            pl.BlockSpec((tile, 1), lambda i: (i, 0)),
        ],
        out_specs=pl.BlockSpec((1, 8, _LANES), lambda i: (i, 0, 0)),
        compiler_params=pltpu.CompilerParams(
            dimension_semantics=("parallel",),
            vmem_limit_bytes=vmem_limit,
        ),
    )(logits, tgt2d)

    tile_sums = partials[:, 0, 0]                     # (num_tiles,)
    return jnp.sum(tile_sums) / jnp.float32(N)        # divide by TRUE batch size


def _reference(logits, target):
    logp = jax.nn.log_softmax(logits.astype(jnp.float32), axis=-1)
    return -jnp.mean(logp[jnp.arange(logits.shape[0]), target])


if __name__ == "__main__":
    key = jax.random.PRNGKey(0)
    k1, k2, k3, k4 = jax.random.split(key, 4)

    # Case 1: small single-tile case (matches the module's simple usage).
    N, C = 8, 32
    logits = jax.random.normal(k1, (N, C), dtype=jnp.float32)
    target = jax.random.randint(k2, (N,), 0, C, dtype=jnp.int32)
    loss_val = jax.block_until_ready(cross_entropy_loss(logits, target))
    ref = _reference(logits, target)
    assert jnp.allclose(loss_val, ref, atol=1e-5, rtol=1e-5), (loss_val, ref)

    # Case 2: multi-tile grid with padded (masked) rows.
    N2, C2 = 20, 48
    logits2 = jax.random.normal(k3, (N2, C2), dtype=jnp.float32)
    target2 = jax.random.randint(k4, (N2,), 0, C2, dtype=jnp.int32)
    loss2 = jax.block_until_ready(
        cross_entropy_loss(logits2, target2, max_tile_n=8))   # forces 3 tiles + 4 pad rows
    ref2 = _reference(logits2, target2)
    assert jnp.allclose(loss2, ref2, atol=1e-5, rtol=1e-5), (loss2, ref2)

    # Case 3: bf16 logits streamed in native dtype (f32 math in-kernel).
    logits_bf16 = logits.astype(jnp.bfloat16)
    loss3 = jax.block_until_ready(cross_entropy_loss(logits_bf16, target))
    ref3 = _reference(logits_bf16, target)
    assert jnp.allclose(loss3, ref3, atol=5e-2, rtol=5e-2), (loss3, ref3)

    print("KERNEL_OK")
</pallas_src>

<mosaic_0001>
module attributes {stable_mosaic.version = 11 : i64} {
  func.func @_ce_tile_kernel(%arg0: i32, %arg1: memref<8x32xf32, #tpu.memory_space<vmem>>, %arg2: memref<8x1xi32, #tpu.memory_space<vmem>>, %arg3: memref<1x8x128xf32, #tpu.memory_space<vmem>>) attributes {dimension_semantics = [#tpu.dimension_semantics<parallel>], iteration_bounds = array<i64: 1>, scalar_prefetch = 0 : i64, scratch_operands = 0 : i64, tpu.core_type = #tpu.core_type<tc>, window_params = [{transform_indices = @transform_0, window_bounds = array<i64: 8, 32>}, {transform_indices = @transform_1, window_bounds = array<i64: 8, 1>}, {transform_indices = @transform_2, window_bounds = array<i64: 1, 8, 128>}]} {
    %c0 = arith.constant 0 : index
    %c0_0 = arith.constant 0 : index
    %0 = vector.load %arg1[%c0, %c0_0] : memref<8x32xf32, #tpu.memory_space<vmem>>, vector<8x32xf32>
    %c0_1 = arith.constant 0 : index
    %c0_2 = arith.constant 0 : index
    %1 = vector.load %arg2[%c0_1, %c0_2] : memref<8x1xi32, #tpu.memory_space<vmem>>, vector<8x1xi32>
    %cst = arith.constant dense<0xFF800000> : vector<8xf32>
    %2 = vector.multi_reduction <maximumf>, %0, %cst [1] : vector<8x32xf32> to vector<8xf32>
    %3 = vector.shape_cast %2 : vector<8xf32> to vector<8x1xf32>
    %4 = vector.broadcast %3 : vector<8x1xf32> to vector<8x32xf32>
    %5 = arith.subf %0, %4 : vector<8x32xf32>
    %6 = math.exp %5 : vector<8x32xf32>
    %cst_3 = arith.constant dense<0.000000e+00> : vector<8xf32>
    %7 = vector.multi_reduction <add>, %6, %cst_3 [1] : vector<8x32xf32> to vector<8xf32>
    %8 = vector.shape_cast %7 : vector<8xf32> to vector<8x1xf32>
    %9 = tpu.iota {dimensions = array<i32: 1>} : vector<8x32xi32>
    %10 = vector.broadcast %1 : vector<8x1xi32> to vector<8x32xi32>
    %11 = arith.cmpi eq, %9, %10 : vector<8x32xi32>
    %cst_4 = arith.constant 0.000000e+00 : f32
    %12 = vector.broadcast %cst_4 : f32 to vector<8x32xf32>
    %13 = arith.select %11, %5, %12 : vector<8x32xi1>, vector<8x32xf32>
    %cst_5 = arith.constant dense<0.000000e+00> : vector<8xf32>
    %14 = vector.multi_reduction <add>, %13, %cst_5 [1] : vector<8x32xf32> to vector<8xf32>
    %15 = vector.shape_cast %14 : vector<8xf32> to vector<8x1xf32>
    %16 = math.log %8 : vector<8x1xf32>
    %17 = arith.subf %16, %15 : vector<8x1xf32>
    %c0_i32 = arith.constant 0 : i32
    %18 = vector.broadcast %c0_i32 : i32 to vector<8x1xi32>
    %19 = arith.cmpi sge, %1, %18 : vector<8x1xi32>
    %20 = arith.extui %19 : vector<8x1xi1> to vector<8x1xi32>
    %21 = arith.sitofp %20 : vector<8x1xi32> to vector<8x1xf32>
    %22 = arith.mulf %17, %21 : vector<8x1xf32>
    %23 = vector.shape_cast %22 : vector<8x1xf32> to vector<1x8x1xf32>
    %cst_6 = arith.constant dense<0.000000e+00> : vector<1xf32>
    %24 = vector.multi_reduction <add>, %23, %cst_6 [1, 2] : vector<1x8x1xf32> to vector<1xf32>
    %25 = vector.shape_cast %24 : vector<1xf32> to vector<1x1x1xf32>
    %26 = vector.extract %25[0, 0, 0] : f32 from vector<1x1x1xf32>
    %27 = vector.broadcast %26 : f32 to vector<1x8x128xf32>
    %c0_7 = arith.constant 0 : index
    %c0_8 = arith.constant 0 : index
    %c0_9 = arith.constant 0 : index
    %28 = vector.load %arg3[%c0_7, %c0_8, %c0_9] : memref<1x8x128xf32, #tpu.memory_space<vmem>>, vector<1x8x128xf32>
    tpu.vector_store %arg3[%c0_7, %c0_8, %c0_9], %27 {strides = array<i32>} : memref<1x8x128xf32, #tpu.memory_space<vmem>>, vector<1x8x128xf32>,
    return
  }
  func.func @transform_0(%arg0: i32) -> (i32, i32) {
    %c0_i32 = arith.constant 0 : i32
    %c0_i32_0 = arith.constant 0 : i32
    return %arg0, %c0_i32 : i32, i32
  }
  func.func @transform_1(%arg0: i32) -> (i32, i32) {
    %c0_i32 = arith.constant 0 : i32
    %c0_i32_0 = arith.constant 0 : i32
    return %arg0, %c0_i32 : i32, i32
  }
  func.func @transform_2(%arg0: i32) -> (i32, i32, i32) {
    %c0_i32 = arith.constant 0 : i32
    %c0_i32_0 = arith.constant 0 : i32
    %c0_i32_1 = arith.constant 0 : i32
    return %arg0, %c0_i32, %c0_i32_0 : i32, i32, i32
  }
}

</mosaic_0001>

<bundles_post_ra>
// kernel: tpu_custom_call.1
= control target key start
LH: loop header
LB: loop body
LE: loop exit
PB: predicated region body
PF: predicated region fallthrough
CT: control target
= control target key end

     0   :  { %vm14_vm0 = vcmask 261120   ;;  %s142_s0 = inlined_call_operand.vmem [shape: f32[8,32], index: 0, kind: input, shape index: {}]   ;;  %s143_s1 = inlined_call_operand.vmem [shape: s32[8,1], index: 1, kind: input, shape index: {}]   ;;  %s144_s2 = inlined_call_operand.hbm [shape: f32[1,8,128], index: 2, kind: output, shape index: {}]  }
   0x1   :  { %v12_v0 = vld [vmem:[%s142_s0] sm:$0xff] }
   0x2   :  { %7 = vsyncpa [#allocation3], 0  ;;  %v15_v1 = vsel %vm14_vm0, %v12_v0, -inf  ;;  %v103_v2 = vmov 0   ;;  %v13_v3 = vld [vmem:[%s143_s1] sm:$0xff]  ;;  %v24_v7 = vlaneseq  ;;  %v104_v18 = vmov 0.0  }
   0x3   :  { %74 = vset.pattern.permute.xlu0 %v103_v2  ;;  %vm37_vm2 = vcmp.ge.s32.totalorder %v13_v3, 0  ;;  %vm41_vm3 = vcmask 7168   ;;  %s105_s0 = smov [#allocation2]  }
   0x4   :  { %16 = vmax.xlane.f32.xlu0 %v15_v1  ;;  %v25_v8 = vand.u32 127, %v24_v7  ;;  %v68_v19 = vsel %vm37_vm2, 1.0, %v104_v18  ;;  %s60_s1 = sshll.u32 %s105_s0, 4  ;;  %s61_s1 = int_to_ptr.vmem [resolvable:$true] %s60_s1 }
   0x5   :  { %s79_s14 = scalar_lea.vmem %s61_s1, 128  ;;  %p84_p1 = scmp.lt.s32.totalorder %s61_s1, %s61_s1 }
   0x6   :  { %p80_p0 = scmp.ne.s32.totalorder %s61_s1, %s79_s14  ;;  %p85_p2 = scmp.lt.s32.totalorder %s79_s14, %s79_s14 }
   0x8   :  { %p86_p3 = por %p85_p2, %p84_p1 }
   0xa   :  { %p87_p4 = pnand %p86_p3, %p80_p0 }
  0x1a   :  { %27 = vperm.xlu0 %74, %v13_v3  }
  0x91   :  { %v17_v4 = vpop.xlane.xlu0 %16 }
  0x92   :  { %v18_v5 = vsub.f32 %v12_v0, %v17_v4 }
  0x94   :  { %v19_v6 = vmul.f32 1.442695, %v18_v5 }
  0x96   :  { %75 = vpow2.f32 %v19_v6 }
  0x99   :  { %v28_v9 = vpop.permute.xlu0 %27 }
  0x9a   :  { %vm29_vm1 = vcmp.eq.s32.totalorder %v25_v8, %v28_v9 }
  0x9b   :  { %v30_v12 = vsel %vm29_vm1, %v18_v5, 0.0 }
  0x9c   :  { %v31_v13 = vsel %vm14_vm0, %v30_v12, 0.0 }
  0xa0   :  { %v76_v10 = vpop.eup %75 }
  0xa1   :  { %v21_v11 = vsel %vm14_vm0, %v76_v10, 0.0 }
  0xa2   :  { %22 = vadd.xlane.f32.xlu1 %v21_v11 }
  0xa6   :  { %32 = vadd.xlane.f32.xlu1 %v31_v13 }
 0x12f   :  { %v23_v14 = vpop.xlane.xlu1 %22 }
 0x130   :  { %77 = vlog2.f32 %v23_v14 }
 0x133   :  { %v33_v17 = vpop.xlane.xlu1 %32 }
 0x13a   :  { %v78_v15 = vpop.eup %77 }
 0x13b   :  { %v35_v16 = vmul.f32 0.6931472, %v78_v15 }
 0x13d   :  { %v36_v20 = vsub.f32 %v35_v16, %v33_v17 }
 0x13f   :  { %v40_v21 = vmul.f32 %v68_v19, %v36_v20 }
 0x141   :  { %v42_v22 = vsel %vm41_vm3, %v40_v21, 0.0 }
 0x142   :  { %43 = vadd.xlane.f32.xlu1 %v42_v22 }
 0x1cf   :  { %v44_v23 = vpop.xlane.xlu1 %43 }
 0x1d0   :  { %v45_v24 = vrot.slane %v44_v23, 4 }
 0x1d2   :  { %v46_v25 = vadd.f32 %v45_v24, %v44_v23 }
 0x1d4   :  { %v47_v26 = vrot.slane %v46_v25, 2 }
 0x1d6   :  { %v48_v27 = vadd.f32 %v47_v26, %v46_v25 }
 0x1d8   :  { %v49_v28 = vrot.slane %v48_v27, 1 }
 0x1da   :  { %v50_v29 = vadd.f32 %v49_v28, %v48_v27 }
 0x1dc   :  { %69 = vpush %v50_v29 }
 0x20d   :  { %s70_s13 = spop %69 }
 0x20e   :  { %v52_v30 = vstv %s70_s13 }
 0x20f   :  { %53 = vst [vmem:[#allocation2] sm:$0xff] %v52_v30 }
 0x210   :  { %90 = shalt.err (!%p87_p4)
}
 0x211   :  { %s91_s17 = scalar_lea.hbm %s144_s2, 128 }
 0x212   :  { %p92_p5 = scmp.ne.s32.totalorder %s144_s2, %s91_s17  ;;  %p95_p6 = scmp.lt.u32.totalorder %s91_s17, %s144_s2 }
 0x214   :  { %p97_p7 = pnand %p95_p6, %p92_p5 }
 0x216   :  { %100 = shalt.err (!%p97_p7)
}
 0x217   :  { %63 = dma.vmem_to_hbm [thread:$0]  %s61_s1, 128, %s144_s2, [#allocation3]  }
 0x218   :  { %101 = dma.done.wait [#allocation3], 128  }
 0x219   :  { %102 = vsyncadd [#allocation3], 4294967168 }
 0x21a   :  { %67 = vsyncpa [#allocation3], 1 }

</bundles_post_ra>
